<compile_context>
chip_gen: v7x
topology: tpu7x:2x2x1
jax: 0.10.0
libtpu: 0.0.40
codegen_flags: <defaults>
</compile_context>

<pallas_src>
import functools

import jax
import jax.numpy as jnp
from jax import lax
from jax.experimental import pallas as pl
from jax.experimental.pallas import tpu as pltpu


# ----------------------------------------------------------------------------
# Kernel
# ----------------------------------------------------------------------------
def _qmatrix_kernel(xr_ref, xi_ref, wr_ref, wi_ref, bsub_ref, badd_ref,
                    or_ref, oi_ref):
    # Output blocks are K-resident (their index_map ignores k), so they act as
    # f32 accumulators.  Initialize them with the pre-combined biases.
    @pl.when(pl.program_id(2) == 0)
    def _():
        or_ref[...] = jnp.broadcast_to(bsub_ref[...], or_ref.shape)
        oi_ref[...] = jnp.broadcast_to(badd_ref[...], oi_ref.shape)

    xr = xr_ref[...]                      # (tm, tk)
    xi = xi_ref[...]                      # (tm, tk)
    wr = wr_ref[...]                      # (tk, tn) -- pre-transposed (in,out)
    wi = wi_ref[...]                      # (tk, tn)

    # Gauss trick: 3 matmuls instead of 4.  Interleave dot -> accumulate so at
    # most one (tm, tn) f32 MXU result is live at a time (low vreg pressure).
    t1 = jnp.dot(xr, wr, preferred_element_type=jnp.float32)
    or_ref[...] += t1
    oi_ref[...] -= t1
    t2 = jnp.dot(xi, wi, preferred_element_type=jnp.float32)
    or_ref[...] -= t2
    oi_ref[...] -= t2
    ts = jnp.dot(xr + xi, wr + wi, preferred_element_type=jnp.float32)
    oi_ref[...] += ts


# ----------------------------------------------------------------------------
# Helpers
# ----------------------------------------------------------------------------
def _round_up(x, m):
    return (x + m - 1) // m * m


def _pad2(a, rows, cols):
    pr, pc = rows - a.shape[0], cols - a.shape[1]
    if pr == 0 and pc == 0:
        return a
    return jnp.pad(a, ((0, pr), (0, pc)))


def _pick_tile(dim_aligned, align, cap):
    """Balanced tile for an already align-rounded dim.

    Returns (tile, padded_dim): tile is a multiple of `align`, at most ~cap,
    padded_dim is a multiple of tile with near-minimal padding.
    """
    units = dim_aligned // align
    cap_units = max(1, cap // align)
    if units <= cap_units:
        return dim_aligned, dim_aligned
    nblocks = -(-units // cap_units)            # ceil
    tile_units = -(-units // nblocks)           # ceil -> balanced blocks
    tile = tile_units * align
    return tile, nblocks * tile


def _largest_proper_divisor(n):
    for d in range(n // 2, 0, -1):
        if n % d == 0:
            return d
    return 1


# ----------------------------------------------------------------------------
# pallas_call wrapper (jitted; tile sizes are static)
# ----------------------------------------------------------------------------
@functools.partial(jax.jit,
                   static_argnames=("out_f", "tm", "tn", "tk", "use_bf16"))
def _qmatrix_call(input_r, input_i, w_r, w_i, b_sub, b_add,
                  *, out_f, tm, tn, tk, use_bf16):
    B, _ = input_r.shape
    Kp, Np = w_r.shape
    Bp = _round_up(_round_up(B, 8), tm)

    xdt = jnp.bfloat16 if use_bf16 else jnp.float32
    xr = _pad2(input_r.astype(xdt), Bp, Kp)
    xi = _pad2(input_i.astype(xdt), Bp, Kp)

    grid = (Bp // tm, Np // tn, Kp // tk)

    x_bytes = jnp.dtype(xdt).itemsize
    w_bytes = jnp.dtype(w_r.dtype).itemsize
    cost = pl.CostEstimate(
        flops=3 * 2 * Bp * Kp * Np,            # Gauss: 3 matmuls, not 4
        transcendentals=0,
        bytes_accessed=(2 * Bp * Kp * x_bytes + 2 * Kp * Np * w_bytes
                        + 2 * Np * 4 + 2 * Bp * Np * 4),
    )

    out_r, out_i = pl.pallas_call(
        _qmatrix_kernel,
        out_shape=(
            jax.ShapeDtypeStruct((Bp, Np), jnp.float32),
            jax.ShapeDtypeStruct((Bp, Np), jnp.float32),
        ),
        grid_spec=pltpu.PrefetchScalarGridSpec(
            num_scalar_prefetch=0,
            grid=grid,
            in_specs=[
                pl.BlockSpec((tm, tk), lambda i, j, k: (i, k)),   # x_r
                pl.BlockSpec((tm, tk), lambda i, j, k: (i, k)),   # x_i
                pl.BlockSpec((tk, tn), lambda i, j, k: (k, j)),   # W_r (in,out)
                pl.BlockSpec((tk, tn), lambda i, j, k: (k, j)),   # W_i (in,out)
                pl.BlockSpec((1, tn), lambda i, j, k: (0, j)),    # b_r - b_i
                pl.BlockSpec((1, tn), lambda i, j, k: (0, j)),    # b_r + b_i
            ],
            out_specs=(
                pl.BlockSpec((tm, tn), lambda i, j, k: (i, j)),
                pl.BlockSpec((tm, tn), lambda i, j, k: (i, j)),
            ),
        ),
        compiler_params=pltpu.CompilerParams(
            dimension_semantics=("parallel", "parallel", "arbitrary"),
            vmem_limit_bytes=48 * 1024 * 1024,   # safe on v7x (64 MiB VMEM)
        ),
        cost_estimate=cost,
    )(xr, xi, w_r, w_i, b_sub, b_add)

    return out_r[:B, :out_f], out_i[:B, :out_f]


# ----------------------------------------------------------------------------
# Module-like wrapper: one-time weight prep hoisted out of the forward path.
# ----------------------------------------------------------------------------
class QMatrixPallas:
    """Pallas TPU equivalent of the PyTorch QMatrix module.

    forward(input_r, input_i) -> (output_r, output_i) with
        output_r = fc_r(input_r) - fc_i(input_i)
        output_i = fc_r(input_i) + fc_i(input_r)
    """

    def __init__(self, w_r, w_i, b_r, b_i, *, use_bf16=False,
                 tm_cap=512, tn_cap=512, tk_cap=1024):
        out_f, in_f = w_r.shape
        self.in_f, self.out_f = in_f, out_f
        self.use_bf16 = bool(use_bf16)
        self.tm_cap = tm_cap

        kp128 = _round_up(in_f, 128)
        np128 = _round_up(out_f, 128)
        self.tk, self.Kp = _pick_tile(kp128, 128, tk_cap)
        self.tn, self.Np = _pick_tile(np128, 128, tn_cap)

        wdt = jnp.bfloat16 if self.use_bf16 else jnp.float32
        w_r = jnp.asarray(w_r, jnp.float32)
        w_i = jnp.asarray(w_i, jnp.float32)
        b_r = jnp.asarray(b_r, jnp.float32)
        b_i = jnp.asarray(b_i, jnp.float32)

        # One-time prep: transpose to (in, out), pad, optional bf16 cast.
        self.w_r = _pad2(w_r.T, self.Kp, self.Np).astype(wdt)
        self.w_i = _pad2(w_i.T, self.Kp, self.Np).astype(wdt)
        # Pre-combined biases (real output gets b_r - b_i, imag gets b_r + b_i).
        self.b_sub = _pad2((b_r - b_i).reshape(1, out_f), 1, self.Np)
        self.b_add = _pad2((b_r + b_i).reshape(1, out_f), 1, self.Np)

    def __call__(self, input_r, input_i):
        B = input_r.shape[0]
        tm, bp = _pick_tile(_round_up(B, 8), 8, self.tm_cap)
        tn = self.tn
        # v7x has 2 TensorCores sharded over the parallel grid axes: if the
        # (M, N) grid collapsed to a single block, re-split N (no repadding
        # needed since the new tn exactly divides the padded Np).
        if (bp // tm) * (self.Np // tn) == 1 and self.Np >= 256:
            tn = 128 * _largest_proper_divisor(self.Np // 128)
        return _qmatrix_call(
            input_r, input_i, self.w_r, self.w_i, self.b_sub, self.b_add,
            out_f=self.out_f, tm=tm, tn=tn, tk=self.tk,
            use_bf16=self.use_bf16)


# ----------------------------------------------------------------------------
# Reference + self-test
# ----------------------------------------------------------------------------
def _reference(input_r, input_i, w_r, w_i, b_r, b_i):
    hp = lax.Precision.HIGHEST
    fc_r = lambda x: jnp.dot(x, w_r.T, precision=hp) + b_r
    fc_i = lambda x: jnp.dot(x, w_i.T, precision=hp) + b_i
    return fc_r(input_r) - fc_i(input_i), fc_r(input_i) + fc_i(input_r)


def _check(batch, in_features, out_features, seed, *, use_bf16=False,
           atol=1e-4, rtol=1e-4):
    key = jax.random.PRNGKey(seed)
    k_xr, k_xi, k_wr, k_wi, k_br, k_bi = jax.random.split(key, 6)

    input_r = jax.random.normal(k_xr, (batch, in_features), dtype=jnp.float32)
    input_i = jax.random.normal(k_xi, (batch, in_features), dtype=jnp.float32)

    bound = 1.0 / (in_features ** 0.5)
    w_r = jax.random.uniform(k_wr, (out_features, in_features),
                             minval=-bound, maxval=bound, dtype=jnp.float32)
    w_i = jax.random.uniform(k_wi, (out_features, in_features),
                             minval=-bound, maxval=bound, dtype=jnp.float32)
    b_r = jax.random.uniform(k_br, (out_features,),
                             minval=-bound, maxval=bound, dtype=jnp.float32)
    b_i = jax.random.uniform(k_bi, (out_features,),
                             minval=-bound, maxval=bound, dtype=jnp.float32)

    layer = QMatrixPallas(w_r, w_i, b_r, b_i, use_bf16=use_bf16)
    out_r, out_i = layer(input_r, input_i)
    jax.block_until_ready((out_r, out_i))

    ref_r, ref_i = _reference(input_r, input_i, w_r, w_i, b_r, b_i)
    assert out_r.shape == (batch, out_features)
    assert out_i.shape == (batch, out_features)
    if use_bf16:
        scale = float(jnp.maximum(jnp.max(jnp.abs(ref_r)),
                                  jnp.max(jnp.abs(ref_i))))
        err = float(jnp.maximum(jnp.max(jnp.abs(out_r - ref_r)),
                                jnp.max(jnp.abs(out_i - ref_i))))
        assert err <= 0.05 * scale + 1e-3, (err, scale)
    else:
        assert jnp.allclose(out_r, ref_r, atol=atol, rtol=rtol)
        assert jnp.allclose(out_i, ref_i, atol=atol, rtol=rtol)


if __name__ == "__main__":
    # Small shapes matching the module spec (batch=8, in=32, out=64), f32.
    _check(batch=8, in_features=32, out_features=64, seed=0)
    # Unaligned multi-tile shapes: exercises adaptive tiling (528x640x384
    # padded, grid (2, 1, 1)) and the K-resident output accumulation.
    _check(batch=520, in_features=640, out_features=300, seed=0,
           atol=5e-4, rtol=5e-4)
    # bf16 MXU fast path (f32 accumulation), validated with a loose bound.
    _check(batch=8, in_features=32, out_features=64, seed=1, use_bf16=True)
    print("KERNEL_OK")
</pallas_src>

<mosaic_0001>
module attributes {stable_mosaic.version = 11 : i64} {
  func.func @_qmatrix_kernel(%arg0: i32, %arg1: i32, %arg2: i32, %arg3: memref<8x128xf32, #tpu.memory_space<vmem>>, %arg4: memref<8x128xf32, #tpu.memory_space<vmem>>, %arg5: memref<128x128xf32, #tpu.memory_space<vmem>>, %arg6: memref<128x128xf32, #tpu.memory_space<vmem>>, %arg7: memref<1x128xf32, #tpu.memory_space<vmem>>, %arg8: memref<1x128xf32, #tpu.memory_space<vmem>>, %arg9: memref<8x128xf32, #tpu.memory_space<vmem>>, %arg10: memref<8x128xf32, #tpu.memory_space<vmem>>) attributes {dimension_semantics = [#tpu.dimension_semantics<parallel>, #tpu.dimension_semantics<parallel>, #tpu.dimension_semantics<arbitrary>], iteration_bounds = array<i64: 1, 1, 1>, scalar_prefetch = 0 : i64, scratch_operands = 0 : i64, tpu.core_type = #tpu.core_type<tc>, window_params = [{transform_indices = @transform_0, window_bounds = array<i64: 8, 128>}, {transform_indices = @transform_1, window_bounds = array<i64: 8, 128>}, {transform_indices = @transform_2, window_bounds = array<i64: 128, 128>}, {transform_indices = @transform_3, window_bounds = array<i64: 128, 128>}, {transform_indices = @transform_4, window_bounds = array<i64: 1, 128>}, {transform_indices = @transform_5, window_bounds = array<i64: 1, 128>}, {transform_indices = @transform_6, window_bounds = array<i64: 8, 128>}, {transform_indices = @transform_7, window_bounds = array<i64: 8, 128>}]} {
    %c0_i32 = arith.constant 0 : i32
    %0 = arith.cmpi eq, %arg2, %c0_i32 : i32
    %1 = arith.extui %0 : i1 to i32
    %c0_i32_0 = arith.constant 0 : i32
    %2 = arith.cmpi ne, %1, %c0_i32_0 : i32
    scf.if %2 {
      %c0_30 = arith.constant 0 : index
      %c0_31 = arith.constant 0 : index
      %27 = vector.load %arg7[%c0_30, %c0_31] : memref<1x128xf32, #tpu.memory_space<vmem>>, vector<1x128xf32>
      %28 = vector.shape_cast %27 : vector<1x128xf32> to vector<1x128xf32>
      %29 = vector.broadcast %28 : vector<1x128xf32> to vector<8x128xf32>
      %c0_32 = arith.constant 0 : index
      %c0_33 = arith.constant 0 : index
      %30 = vector.load %arg9[%c0_32, %c0_33] : memref<8x128xf32, #tpu.memory_space<vmem>>, vector<8x128xf32>
      tpu.vector_store %arg9[%c0_32, %c0_33], %29 {strides = array<i32>} : memref<8x128xf32, #tpu.memory_space<vmem>>, vector<8x128xf32>,
      %c0_34 = arith.constant 0 : index
      %c0_35 = arith.constant 0 : index
      %31 = vector.load %arg8[%c0_34, %c0_35] : memref<1x128xf32, #tpu.memory_space<vmem>>, vector<1x128xf32>
      %32 = vector.shape_cast %31 : vector<1x128xf32> to vector<1x128xf32>
      %33 = vector.broadcast %32 : vector<1x128xf32> to vector<8x128xf32>
      %c0_36 = arith.constant 0 : index
      %c0_37 = arith.constant 0 : index
      %34 = vector.load %arg10[%c0_36, %c0_37] : memref<8x128xf32, #tpu.memory_space<vmem>>, vector<8x128xf32>
      tpu.vector_store %arg10[%c0_36, %c0_37], %33 {strides = array<i32>} : memref<8x128xf32, #tpu.memory_space<vmem>>, vector<8x128xf32>,
    } else {
    }
    %c0 = arith.constant 0 : index
    %c0_1 = arith.constant 0 : index
    %3 = vector.load %arg3[%c0, %c0_1] : memref<8x128xf32, #tpu.memory_space<vmem>>, vector<8x128xf32>
    %c0_2 = arith.constant 0 : index
    %c0_3 = arith.constant 0 : index
    %4 = vector.load %arg4[%c0_2, %c0_3] : memref<8x128xf32, #tpu.memory_space<vmem>>, vector<8x128xf32>
    %c0_4 = arith.constant 0 : index
    %c0_5 = arith.constant 0 : index
    %5 = vector.load %arg5[%c0_4, %c0_5] : memref<128x128xf32, #tpu.memory_space<vmem>>, vector<128x128xf32>
    %c0_6 = arith.constant 0 : index
    %c0_7 = arith.constant 0 : index
    %6 = vector.load %arg6[%c0_6, %c0_7] : memref<128x128xf32, #tpu.memory_space<vmem>>, vector<128x128xf32>
    %cst = arith.constant dense<0.000000e+00> : vector<8x128xf32>
    %7 = tpu.matmul %3, %5, %cst {dimension_numbers = #tpu.dot_dimension_numbers<[1], [0], [0], [1], [0, 0, 1, 1], [], []>} : vector<8x128xf32>, vector<128x128xf32>, vector<8x128xf32> -> vector<8x128xf32>
    %c0_8 = arith.constant 0 : index
    %c0_9 = arith.constant 0 : index
    %8 = vector.load %arg9[%c0_8, %c0_9] : memref<8x128xf32, #tpu.memory_space<vmem>>, vector<8x128xf32>
    %9 = arith.addf %8, %7 : vector<8x128xf32>
    %c0_10 = arith.constant 0 : index
    %c0_11 = arith.constant 0 : index
    %10 = vector.load %arg9[%c0_10, %c0_11] : memref<8x128xf32, #tpu.memory_space<vmem>>, vector<8x128xf32>
    tpu.vector_store %arg9[%c0_10, %c0_11], %9 {strides = array<i32>} : memref<8x128xf32, #tpu.memory_space<vmem>>, vector<8x128xf32>,
    %c0_12 = arith.constant 0 : index
    %c0_13 = arith.constant 0 : index
    %11 = vector.load %arg10[%c0_12, %c0_13] : memref<8x128xf32, #tpu.memory_space<vmem>>, vector<8x128xf32>
    %12 = arith.subf %11, %7 : vector<8x128xf32>
    %c0_14 = arith.constant 0 : index
    %c0_15 = arith.constant 0 : index
    %13 = vector.load %arg10[%c0_14, %c0_15] : memref<8x128xf32, #tpu.memory_space<vmem>>, vector<8x128xf32>
    tpu.vector_store %arg10[%c0_14, %c0_15], %12 {strides = array<i32>} : memref<8x128xf32, #tpu.memory_space<vmem>>, vector<8x128xf32>,
    %cst_16 = arith.constant dense<0.000000e+00> : vector<8x128xf32>
    %14 = tpu.matmul %4, %6, %cst_16 {dimension_numbers = #tpu.dot_dimension_numbers<[1], [0], [0], [1], [0, 0, 1, 1], [], []>} : vector<8x128xf32>, vector<128x128xf32>, vector<8x128xf32> -> vector<8x128xf32>
    %c0_17 = arith.constant 0 : index
    %c0_18 = arith.constant 0 : index
    %15 = vector.load %arg9[%c0_17, %c0_18] : memref<8x128xf32, #tpu.memory_space<vmem>>, vector<8x128xf32>
    %16 = arith.subf %15, %14 : vector<8x128xf32>
    %c0_19 = arith.constant 0 : index
    %c0_20 = arith.constant 0 : index
    %17 = vector.load %arg9[%c0_19, %c0_20] : memref<8x128xf32, #tpu.memory_space<vmem>>, vector<8x128xf32>
    tpu.vector_store %arg9[%c0_19, %c0_20], %16 {strides = array<i32>} : memref<8x128xf32, #tpu.memory_space<vmem>>, vector<8x128xf32>,
    %c0_21 = arith.constant 0 : index
    %c0_22 = arith.constant 0 : index
    %18 = vector.load %arg10[%c0_21, %c0_22] : memref<8x128xf32, #tpu.memory_space<vmem>>, vector<8x128xf32>
    %19 = arith.subf %18, %14 : vector<8x128xf32>
    %c0_23 = arith.constant 0 : index
    %c0_24 = arith.constant 0 : index
    %20 = vector.load %arg10[%c0_23, %c0_24] : memref<8x128xf32, #tpu.memory_space<vmem>>, vector<8x128xf32>
    tpu.vector_store %arg10[%c0_23, %c0_24], %19 {strides = array<i32>} : memref<8x128xf32, #tpu.memory_space<vmem>>, vector<8x128xf32>,
    %21 = arith.addf %3, %4 : vector<8x128xf32>
    %22 = arith.addf %5, %6 : vector<128x128xf32>
    %cst_25 = arith.constant dense<0.000000e+00> : vector<8x128xf32>
    %23 = tpu.matmul %21, %22, %cst_25 {dimension_numbers = #tpu.dot_dimension_numbers<[1], [0], [0], [1], [0, 0, 1, 1], [], []>} : vector<8x128xf32>, vector<128x128xf32>, vector<8x128xf32> -> vector<8x128xf32>
    %c0_26 = arith.constant 0 : index
    %c0_27 = arith.constant 0 : index
    %24 = vector.load %arg10[%c0_26, %c0_27] : memref<8x128xf32, #tpu.memory_space<vmem>>, vector<8x128xf32>
    %25 = arith.addf %24, %23 : vector<8x128xf32>
    %c0_28 = arith.constant 0 : index
    %c0_29 = arith.constant 0 : index
    %26 = vector.load %arg10[%c0_28, %c0_29] : memref<8x128xf32, #tpu.memory_space<vmem>>, vector<8x128xf32>
    tpu.vector_store %arg10[%c0_28, %c0_29], %25 {strides = array<i32>} : memref<8x128xf32, #tpu.memory_space<vmem>>, vector<8x128xf32>,
    return
  }
  func.func @transform_0(%arg0: i32, %arg1: i32, %arg2: i32) -> (i32, i32) {
    %c0_i32 = arith.constant 0 : i32
    return %arg0, %arg2 : i32, i32
  }
  func.func @transform_1(%arg0: i32, %arg1: i32, %arg2: i32) -> (i32, i32) {
    %c0_i32 = arith.constant 0 : i32
    return %arg0, %arg2 : i32, i32
  }
  func.func @transform_2(%arg0: i32, %arg1: i32, %arg2: i32) -> (i32, i32) {
    %c0_i32 = arith.constant 0 : i32
    return %arg2, %arg1 : i32, i32
  }
  func.func @transform_3(%arg0: i32, %arg1: i32, %arg2: i32) -> (i32, i32) {
    %c0_i32 = arith.constant 0 : i32
    return %arg2, %arg1 : i32, i32
  }
  func.func @transform_4(%arg0: i32, %arg1: i32, %arg2: i32) -> (i32, i32) {
    %c0_i32 = arith.constant 0 : i32
    %c0_i32_0 = arith.constant 0 : i32
    return %c0_i32, %arg1 : i32, i32
  }
  func.func @transform_5(%arg0: i32, %arg1: i32, %arg2: i32) -> (i32, i32) {
    %c0_i32 = arith.constant 0 : i32
    %c0_i32_0 = arith.constant 0 : i32
    return %c0_i32, %arg1 : i32, i32
  }
  func.func @transform_6(%arg0: i32, %arg1: i32, %arg2: i32) -> (i32, i32) {
    %c0_i32 = arith.constant 0 : i32
    return %arg0, %arg1 : i32, i32
  }
  func.func @transform_7(%arg0: i32, %arg1: i32, %arg2: i32) -> (i32, i32) {
    %c0_i32 = arith.constant 0 : i32
    return %arg0, %arg1 : i32, i32
  }
}

</mosaic_0001>

<bundles_post_ra>
// kernel: _qmatrix_call.1
= control target key start
LH: loop header
LB: loop body
LE: loop exit
PB: predicated region body
PF: predicated region fallthrough
CT: control target
= control target key end

     0   :  { %13 = vsyncpa [#allocation3], 0  ;;  %s927_s0 = inlined_call_operand.vmem [shape: f32[8,128], index: 0, kind: input, shape index: {}]   ;;  %s928_s1 = inlined_call_operand.vmem [shape: f32[8,128], index: 1, kind: input, shape index: {}]   ;;  %s929_s2 = inlined_call_operand.hbm [shape: f32[128,128], index: 2, kind: input, shape index: {}]   ;;  %s930_s3 = inlined_call_operand.hbm [shape: f32[128,128], index: 3, kind: input, shape index: {}]   ;;  %s931_s4 = inlined_call_operand.vmem [shape: f32[1,128], index: 4, kind: input, shape index: {}]   ;;  %s932_s5 = inlined_call_operand.vmem [shape: f32[1,128], index: 5, kind: input, shape index: {}]   ;;  %s933_s6 = inlined_call_operand.hbm [shape: f32[8,128], index: 6, kind: output, shape index: {0}]   ;;  %s934_s7 = inlined_call_operand.hbm [shape: f32[8,128], index: 7, kind: output, shape index: {1}]  }
   0x1   :  { %14 = vsyncpa [#allocation6], 0 }
   0x2   :  { %15 = vsyncpa [#allocation4], 0 }
   0x3   :  { %16 = vsyncpa [#allocation9], 0  ;;  %s716_s24 = smov [#allocation2]   ;;  %s620_s28 = scalar_lea.hbm %s929_s2, 2048 }
   0x4   :  { %s26_s25 = sshll.u32 %s716_s24, 4  ;;  %p621_p0 = scmp.ne.s32.totalorder %s929_s2, %s620_s28  ;;  %s27_s25 = int_to_ptr.vmem [resolvable:$true] %s26_s25 }
   0x5   :  { %p624_p1 = scmp.lt.u32.totalorder %s620_s28, %s929_s2 }
   0x7   :  { %p626_p2 = pnand %p624_p1, %p621_p0 }
   0x9   :  { %629 = shalt.err (!%p626_p2)
}
   0xa   :  { %s630_s10 = scalar_lea.vmem %s27_s25, 2048  ;;  %p635_p4 = scmp.lt.s32.totalorder %s27_s25, %s27_s25 }
   0xb   :  { %p631_p3 = scmp.ne.s32.totalorder %s27_s25, %s630_s10  ;;  %p636_p5 = scmp.lt.s32.totalorder %s630_s10, %s630_s10 }
   0xd   :  { %p637_p6 = por %p636_p5, %p635_p4 }
   0xf   :  { %p638_p7 = pnand %p637_p6, %p631_p3 }
  0x11   :  { %641 = shalt.err (!%p638_p7)
}
  0x12   :  { %s717_s11 = smov 128   ;;  %s718_s12 = smov 8  }
  0x13   :  { %32 = dma.hbm_to_vmem [thread:$0]  %s929_s2, 2048, %s27_s25, [#allocation3], %s717_s11, %s717_s11, %s718_s12  }
  0x14   :  { %s719_s15 = smov [#allocation5]   ;;  %s642_s19 = scalar_lea.hbm %s930_s3, 2048 }
  0x15   :  { %s38_s16 = sshll.u32 %s719_s15, 4  ;;  %p643_p8 = scmp.ne.s32.totalorder %s930_s3, %s642_s19  ;;  %s39_s16 = int_to_ptr.vmem [resolvable:$true] %s38_s16 }
  0x16   :  { %p646_p9 = scmp.lt.u32.totalorder %s642_s19, %s930_s3 }
  0x18   :  { %p648_p10 = pnand %p646_p9, %p643_p8 }
  0x1a   :  { %651 = shalt.err (!%p648_p10)
}
  0x1b   :  { %s652_s24 = scalar_lea.vmem %s39_s16, 2048  ;;  %p657_p12 = scmp.lt.s32.totalorder %s39_s16, %s39_s16 }
  0x1c   :  { %p653_p11 = scmp.ne.s32.totalorder %s39_s16, %s652_s24  ;;  %p658_p13 = scmp.lt.s32.totalorder %s652_s24, %s652_s24 }
  0x1e   :  { %p659_p0 = por %p658_p13, %p657_p12 }
  0x20   :  { %p660_p1 = pnand %p659_p0, %p653_p11 }
  0x22   :  { %663 = shalt.err (!%p660_p1)
}
  0x23   :  { %44 = dma.hbm_to_vmem [thread:$0]  %s930_s3, 2048, %s39_s16, [#allocation6], %s717_s11, %s717_s11, %s718_s12  }
  0x24   :  { %708 = dma.done.wait [#allocation3], 2048  }
  0x25   :  { %709 = vsyncadd [#allocation3], 4294965248 }
  0x26   :  { %710 = dma.done.wait [#allocation6], 2048  }
  0x27   :  { %711 = vsyncadd [#allocation6], 4294965248  ;;  %v720_v0 = vmov 0.0|0.0   ;;  %vm721_vm0 = vmmov 0   ;;  %v722_v1 = vmov 0.0   ;;  %v795_v2 = vld [vmem:[#allocation2] sm:$0xff] }
  0x28   :  { %539 = vmatprep.subr.bf16.mxu0 %v720_v0  ;;  %563 = vmatprep.subr.bf16.mxu1 %v720_v0  ;;  %v797_v3 = vld [vmem:[#allocation2 + $0x8] sm:$0xff]  ;;  %v799_v4 = vld [vmem:[#allocation2 + $0x10] sm:$0xff]  ;;  %v803_v6 = vld [vmem:[#allocation2 + $0x18] sm:$0xff]  ;;  %s723_s8 = smov [#allocation7]  }
  0x29   :  { %466 = vmatprep.mubr.msk.f32.mxu0 %vm721_vm0, %v722_v1  ;;  %501 = vmatprep.mubr.msk.f32.mxu1 %vm721_vm0, %v722_v1  ;;  %v540_v5 = vpack.c.bf16 %v797_v3, %v795_v2  ;;  %v805_v7 = vld [vmem:[#allocation5] sm:$0xff]  ;;  %v807_v8 = vld [vmem:[#allocation5 + $0x8] sm:$0xff]  ;;  %v543_v9 = vpack.c.bf16 %v803_v6, %v799_v4  ;;  %v813_v11 = vld [vmem:[#allocation5 + $0x10] sm:$0xff]  ;;  %s357_s9 = sshll.u32 %s723_s8, 4  ;;  %s358_s9 = int_to_ptr.vmem [resolvable:$true] %s357_s9 }
  0x2a   :  { %v564_v10 = vpack.c.bf16 %v807_v8, %v805_v7  ;;  %v815_v12 = vld [vmem:[#allocation5 + $0x18] sm:$0xff]  ;;  %v818_v13 = vld [vmem:[#allocation2 + $0x20] sm:$0xff]  ;;  %v820_v14 = vld [vmem:[#allocation2 + $0x28] sm:$0xff]  ;;  %v262_v48 = vadd.f32 %v805_v7, %v795_v2  ;;  %v263_v49 = vadd.f32 %v807_v8, %v797_v3  ;;  %v264_v53 = vadd.f32 %v813_v11, %v799_v4  ;;  %s664_s10 = scalar_lea.vmem %s358_s9, 128  ;;  %p669_p3 = scmp.lt.s32.totalorder %s358_s9, %s358_s9 }
  0x2b   :  { %541 = vmatpush3.bf16.msra.mxu0 %v540_v5  ;;  %v567_v15 = vpack.c.bf16 %v815_v12, %v813_v11  ;;  %v825_v16 = vld [vmem:[#allocation5 + $0x20] sm:$0xff]  ;;  %v827_v17 = vld [vmem:[#allocation5 + $0x28] sm:$0xff]  ;;  %v546_v18 = vpack.c.bf16 %v820_v14, %v818_v13  ;;  %v832_v19 = vld [vmem:[#allocation2 + $0x30] sm:$0xff]  ;;  %v265_v54 = vadd.f32 %v815_v12, %v803_v6  ;;  %p665_p2 = scmp.ne.s32.totalorder %s358_s9, %s664_s10  ;;  %p670_p4 = scmp.lt.s32.totalorder %s664_s10, %s664_s10 }
  0x2c   :  { %542 = vmatprep.subr.bf16.mxu0 %v720_v0  ;;  %565 = vmatpush3.bf16.msra.mxu1 %v564_v10  ;;  %v834_v20 = vld [vmem:[#allocation2 + $0x38] sm:$0xff]  ;;  %v570_v21 = vpack.c.bf16 %v827_v17, %v825_v16  ;;  %v839_v22 = vld [vmem:[#allocation5 + $0x30] sm:$0xff]  ;;  %v846_v25 = vld [vmem:[#allocation2 + $0x40] sm:$0xff]  ;;  %v588_v52 = vpack.c.bf16 %v263_v49, %v262_v48  ;;  %v266_v57 = vadd.f32 %v825_v16, %v818_v13 }
  0x2d   :  { %566 = vmatprep.subr.bf16.mxu1 %v720_v0  ;;  %v841_v23 = vld [vmem:[#allocation5 + $0x38] sm:$0xff]  ;;  %v549_v24 = vpack.c.bf16 %v834_v20, %v832_v19  ;;  %v848_v26 = vld [vmem:[#allocation2 + $0x48] sm:$0xff]  ;;  %v101_v28 = vld [vmem:[#allocation5 + $0x40] sm:$0xff]  ;;  %v267_v58 = vadd.f32 %v827_v17, %v820_v14  ;;  %v591_v59 = vpack.c.bf16 %v265_v54, %v264_v53  ;;  %v268_v60 = vadd.f32 %v839_v22, %v832_v19  ;;  %p671_p5 = por %p670_p4, %p669_p3 }
  0x2e   :  { %v573_v27 = vpack.c.bf16 %v841_v23, %v839_v22  ;;  %v102_v29 = vld [vmem:[#allocation5 + $0x48] sm:$0xff]  ;;  %v552_v30 = vpack.c.bf16 %v848_v26, %v846_v25  ;;  %v87_v31 = vld [vmem:[#allocation2 + $0x50] sm:$0xff]  ;;  %v88_v32 = vld [vmem:[#allocation2 + $0x58] sm:$0xff]  ;;  %v269_v61 = vadd.f32 %v841_v23, %v834_v20  ;;  %v270_v63 = vadd.f32 %v101_v28, %v846_v25 }
  0x2f   :  { %544 = vmatpush3.bf16.msra.mxu0 %v543_v9  ;;  %v576_v33 = vpack.c.bf16 %v102_v29, %v101_v28  ;;  %v103_v34 = vld [vmem:[#allocation5 + $0x50] sm:$0xff]  ;;  %v104_v35 = vld [vmem:[#allocation5 + $0x58] sm:$0xff]  ;;  %v555_v36 = vpack.c.bf16 %v88_v32, %v87_v31  ;;  %v89_v37 = vld [vmem:[#allocation2 + $0x60] sm:$0xff]  ;;  %v594_v62 = vpack.c.bf16 %v267_v58, %v266_v57  ;;  %v271_v2 = vadd.f32 %v102_v29, %v848_v26  ;;  %p672_p6 = pnand %p671_p5, %p665_p2 }
  0x30   :  { %545 = vmatprep.subr.bf16.mxu0 %v720_v0  ;;  %568 = vmatpush3.bf16.msra.mxu1 %v567_v15  ;;  %v90_v38 = vld [vmem:[#allocation2 + $0x68] sm:$0xff]  ;;  %v579_v39 = vpack.c.bf16 %v104_v35, %v103_v34  ;;  %v105_v40 = vld [vmem:[#allocation5 + $0x60] sm:$0xff]  ;;  %v91_v43 = vld [vmem:[#allocation2 + $0x70] sm:$0xff]  ;;  %v597_v3 = vpack.c.bf16 %v269_v61, %v268_v60  ;;  %v273_v4 = vadd.f32 %v104_v35, %v88_v32 }
  0x31   :  { %569 = vmatprep.subr.bf16.mxu1 %v720_v0  ;;  %v106_v41 = vld [vmem:[#allocation5 + $0x68] sm:$0xff]  ;;  %v558_v42 = vpack.c.bf16 %v90_v38, %v89_v37  ;;  %v92_v44 = vld [vmem:[#allocation2 + $0x78] sm:$0xff]  ;;  %v107_v46 = vld [vmem:[#allocation5 + $0x70] sm:$0xff]  ;;  %v600_v5 = vpack.c.bf16 %v271_v2, %v270_v63  ;;  %v274_v6 = vadd.f32 %v105_v40, %v89_v37 }
  0x32   :  { %v582_v45 = vpack.c.bf16 %v106_v41, %v105_v40  ;;  %v108_v47 = vld [vmem:[#allocation5 + $0x78] sm:$0xff]  ;;  %v561_v50 = vpack.c.bf16 %v92_v44, %v91_v43  ;;  %v75_v55 = vld [vmem:[%s927_s0] sm:$0xff]  ;;  %v275_v7 = vadd.f32 %v106_v41, %v90_v38  ;;  %v276_v9 = vadd.f32 %v107_v46, %v91_v43 }
  0x33   :  { %547 = vmatpush3.bf16.msra.mxu0 %v546_v18  ;;  %v585_v51 = vpack.c.bf16 %v108_v47, %v107_v46  ;;  %v76_v56 = vld [vmem:[%s928_s1] sm:$0xff]  ;;  %v277_v10 = vadd.f32 %v108_v47, %v92_v44 }
  0x34   :  { %548 = vmatprep.subr.bf16.mxu0 %v720_v0  ;;  %571 = vmatpush3.bf16.msra.mxu1 %v570_v21  ;;  %v606_v11 = vpack.c.bf16 %v275_v7, %v274_v6  ;;  %v261_v13 = vadd.f32 %v76_v56, %v75_v55  ;;  %v381_v14 = vld [vmem:[%s931_s4] ss:$0 sm:$0xff] }
  0x35   :  { %572 = vmatprep.subr.bf16.mxu1 %v720_v0  ;;  %v609_v12 = vpack.c.bf16 %v277_v10, %v276_v9  ;;  %v382_v15 = vld [vmem:[%s932_s5] ss:$0 sm:$0xff] }
  0x37   :  { %550 = vmatpush3.bf16.msra.mxu0 %v549_v24 }
  0x38   :  { %551 = vmatprep.subr.bf16.mxu0 %v720_v0  ;;  %574 = vmatpush3.bf16.msra.mxu1 %v573_v27 }
  0x39   :  { %575 = vmatprep.subr.bf16.mxu1 %v720_v0 }
  0x3b   :  { %553 = vmatpush3.bf16.msra.mxu0 %v552_v30 }
  0x3c   :  { %554 = vmatprep.subr.bf16.mxu0 %v720_v0  ;;  %577 = vmatpush3.bf16.msra.mxu1 %v576_v33 }
  0x3d   :  { %578 = vmatprep.subr.bf16.mxu1 %v720_v0 }
  0x3f   :  { %556 = vmatpush3.bf16.msra.mxu0 %v555_v36 }
  0x40   :  { %557 = vmatprep.subr.bf16.mxu0 %v720_v0  ;;  %580 = vmatpush3.bf16.msra.mxu1 %v579_v39 }
  0x41   :  { %581 = vmatprep.subr.bf16.mxu1 %v720_v0 }
  0x43   :  { %559 = vmatpush3.bf16.msra.mxu0 %v558_v42 }
  0x44   :  { %560 = vmatprep.subr.bf16.mxu0 %v720_v0  ;;  %583 = vmatpush3.bf16.msra.mxu1 %v582_v45 }
  0x45   :  { %584 = vmatprep.subr.bf16.mxu1 %v720_v0 }
  0x47   :  { %562 = vmatpush3.bf16.msra.mxu0 %v561_v50 }
  0x48   :  { %587 = vmatprep.subr.bf16.mxu0 %v720_v0  ;;  %586 = vmatpush3.bf16.msra.mxu1 %v585_v51 }
  0x4a   :  { %467 = vmatmul.mubr.f32.vlgmr.msra.gmra.mrb[0].mxu0 %v75_v55 }
  0x4b   :  { %589 = vmatpush3.bf16.msra.mxu0 %v588_v52  ;;  %536 = vmatprep.mubr.msk.f32.mxu0 %vm721_vm0, %v722_v1  ;;  %v272_v1 = vadd.f32 %v103_v34, %v87_v31 }
  0x4c   :  { %590 = vmatprep.subr.bf16.mxu0 %v720_v0  ;;  %502 = vmatmul.mubr.f32.vlgmr.msra.gmra.mrb[0].mxu1 %v76_v56 }
  0x4d   :  { %v603_v8 = vpack.c.bf16 %v273_v4, %v272_v1 }
  0x4f   :  { %592 = vmatpush3.bf16.msra.mxu0 %v591_v59 }
  0x50   :  { %593 = vmatprep.subr.bf16.mxu0 %v720_v0 }
  0x53   :  { %595 = vmatpush3.bf16.msra.mxu0 %v594_v62 }
  0x54   :  { %596 = vmatprep.subr.bf16.mxu0 %v720_v0 }
  0x57   :  { %598 = vmatpush3.bf16.msra.mxu0 %v597_v3 }
  0x58   :  { %599 = vmatprep.subr.bf16.mxu0 %v720_v0 }
  0x5b   :  { %601 = vmatpush3.bf16.msra.mxu0 %v600_v5 }
  0x5c   :  { %602 = vmatprep.subr.bf16.mxu0 %v720_v0 }
  0x5f   :  { %604 = vmatpush3.bf16.msra.mxu0 %v603_v8 }
  0x60   :  { %605 = vmatprep.subr.bf16.mxu0 %v720_v0 }
  0x63   :  { %607 = vmatpush3.bf16.msra.mxu0 %v606_v11 }
  0x64   :  { %608 = vmatprep.subr.bf16.mxu0 %v720_v0 }
  0x67   :  { %610 = vmatpush3.bf16.msra.mxu0 %v609_v12 }
  0x6a   :  { %537 = vmatmul.mubr.f32.vlgmr.msra.gmra.mrb[2].mxu0 %v261_v13 }
 0x11d   :  { %v175_v16 = vpop.f32.mrb[0].mxu0 }
 0x11e   :  { %v180_v17 = vadd.f32 %v381_v14, %v175_v16  ;;  %v183_v18 = vsub.f32 %v382_v15, %v175_v16  ;;  %v468_v19 = vpop.f32.mrb[1].mxu0 }
 0x11f   :  { %v251_v20 = vpop.f32.mrb[0].mxu1 }
 0x120   :  { %v256_v21 = vsub.f32 %v180_v17, %v251_v20  ;;  %v259_v0 = vsub.f32 %v183_v18, %v251_v20  ;;  %v503_v22 = vpop.f32.mrb[1].mxu1 }
 0x122   :  { %257 = vst [vmem:[#allocation7] sm:$0xff] %v256_v21 }
 0x123   :  { %675 = shalt.err (!%p672_p6)
}
 0x124   :  { %s676_s11 = scalar_lea.hbm %s933_s6, 128 }
 0x125   :  { %p677_p7 = scmp.ne.s32.totalorder %s933_s6, %s676_s11  ;;  %p680_p8 = scmp.lt.u32.totalorder %s676_s11, %s933_s6 }
 0x127   :  { %p682_p9 = pnand %p680_p8, %p677_p7 }
 0x129   :  { %685 = shalt.err (!%p682_p9)
}
 0x12a   :  { %360 = dma.vmem_to_hbm [thread:$0]  %s358_s9, 128, %s933_s6, [#allocation4]  }
 0x12b   :  { %s724_s18 = smov [#allocation8]  }
 0x12c   :  { %s367_s19 = sshll.u32 %s724_s18, 4  ;;  %s368_s19 = int_to_ptr.vmem [resolvable:$true] %s367_s19 }
 0x12d   :  { %s686_s20 = scalar_lea.vmem %s368_s19, 128  ;;  %p691_p11 = scmp.lt.s32.totalorder %s368_s19, %s368_s19 }
 0x12e   :  { %p687_p10 = scmp.ne.s32.totalorder %s368_s19, %s686_s20  ;;  %p692_p12 = scmp.lt.s32.totalorder %s686_s20, %s686_s20 }
 0x130   :  { %p693_p13 = por %p692_p12, %p691_p11 }
 0x132   :  { %p694_p0 = pnand %p693_p13, %p687_p10 }
 0x13d   :  { %v344_v23 = vpop.f32.mrb[2].mxu0 }
 0x13e   :  { %v349_v24 = vadd.f32 %v344_v23, %v259_v0  ;;  %v538_v25 = vpop.f32.mrb[3].mxu0 }
 0x140   :  { %350 = vst [vmem:[#allocation8] sm:$0xff] %v349_v24 }
 0x141   :  { %697 = shalt.err (!%p694_p0)
}
 0x142   :  { %s698_s23 = scalar_lea.hbm %s934_s7, 128 }
 0x143   :  { %p699_p1 = scmp.ne.s32.totalorder %s934_s7, %s698_s23  ;;  %p702_p2 = scmp.lt.u32.totalorder %s698_s23, %s934_s7 }
 0x145   :  { %p704_p3 = pnand %p702_p2, %p699_p1 }
 0x147   :  { %707 = shalt.err (!%p704_p3)
}
 0x148   :  { %370 = dma.vmem_to_hbm [thread:$0]  %s368_s19, 128, %s934_s7, [#allocation9]  }
 0x149   :  { %712 = dma.done.wait [#allocation4], 128  }
 0x14a   :  { %713 = vsyncadd [#allocation4], 4294967168 }
 0x14b   :  { %714 = dma.done.wait [#allocation9], 128  }
 0x14c   :  { %715 = vsyncadd [#allocation9], 4294967168 }
 0x14d   :  { %377 = vsyncpa [#allocation3], 1 }
 0x14e   :  { %378 = vsyncpa [#allocation6], 1 }
 0x14f   :  { %379 = vsyncpa [#allocation4], 1 }
 0x150   :  { %380 = vsyncpa [#allocation9], 1 }

</bundles_post_ra>
